<compile_context>
chip_gen: v5e
topology: v5e:2x2
jax: 0.10.0
libtpu: 0.0.40
codegen_flags: <defaults>
</compile_context>

<pallas_src>
import jax
import jax.numpy as jnp
from jax import lax
from jax.experimental import pallas as pl
from jax.experimental.pallas import tpu as pltpu


def _attention_kernel(h_src_ref, q_ref, bias_ref, out_ref):
    # h_src_ref: (TB, S, H)  source hidden states (native dtype)
    # q_ref:     (TB, H)     pre-projected query (f32)
    # bias_ref:  (TB, S)     additive mask bias (0 / -1e30, f32)
    # out_ref:   (TB, H)     context vector
    h_src = h_src_ref[...].astype(jnp.float32)   # upcast after load (v5e has no bf16 VALU)
    q = q_ref[...]                                # (TB, H)
    bias = bias_ref[...]                          # (TB, S)

    # scores[b, s] = sum_h q[b, h] * h_src[b, s, h]
    # VPU broadcast-multiply + lane reduction (avoids TB tiny M=1 MXU matmuls).
    scores = jnp.sum(h_src * q[:, None, :], axis=-1) + bias          # (TB, S)

    # Numerically-stable softmax over S.  Exact divide: the op is HBM-bound,
    # so the divide is free and matches the PyTorch reference more closely.
    m = jnp.max(scores, axis=-1, keepdims=True)
    e = jnp.exp(scores - m)
    denom = jnp.sum(e, axis=-1, keepdims=True)
    weight = e / denom                                               # (TB, S)

    # context[b, h] = sum_s weight[b, s] * h_src[b, s, h]
    context = jnp.sum(weight[:, :, None] * h_src, axis=1)            # (TB, H)
    out_ref[...] = context.astype(out_ref.dtype)


def _pick_batch_tile(B, tb, tb_cap):
    cand = max(1, min(tb, B, tb_cap))
    # Prefer >=2 grid steps when the batch is big enough, so
    # dimension_semantics=("parallel",) can shard across v7x's two TensorCores.
    if B >= 16:
        cand = min(cand, pl.cdiv(B, 2))
    if cand >= B:
        return B                      # block dims equal full array dims -> OK
    cand = max(8, (cand // 8) * 8)    # 2-D (TB,S)/(TB,H) blocks need TB % 8 == 0
    for t in range(cand, 7, -8):      # prefer a divisor of B -> no HBM padding
        if B % t == 0:
            return t
    return cand                       # rare fallback: pad the batch


def attention_forward(h_src, h_t_tgt, weight_linear, mask=None, *, tb=512):
    """h_src: (B,S,H), h_t_tgt: (B,1,H), weight_linear: (H,H) PyTorch Linear
    weight (out x in), mask: optional (B,S) bool (True = masked).
    Returns context: (B,1,H) in h_src.dtype."""
    B, S, H = h_src.shape
    out_dtype = h_src.dtype

    # Hoisted out of the kernel: one well-shaped MXU matmul (PyTorch: x @ W^T).
    query = jnp.einsum(
        "bh,oh->bo",
        h_t_tgt[:, 0, :].astype(jnp.float32),
        weight_linear.astype(jnp.float32),
        precision=lax.Precision.HIGHEST,
        preferred_element_type=jnp.float32)                          # (B, H)

    # Additive mask bias: 0 where valid, -1e30 where masked (exp underflows to 0).
    # NOTE: fully-masked rows yield a uniform distribution here, whereas
    # PyTorch's masked_fill(-inf) + softmax yields NaN for such rows.
    if mask is None:
        bias = jnp.zeros((B, S), dtype=jnp.float32)
    else:
        bias = jnp.where(mask.reshape(B, S), jnp.float32(-1e30), jnp.float32(0.0))

    # Generation-aware VMEM budget for the double-buffered h_src stream.
    try:
        vmem_cap = pltpu.get_tpu_info().vmem_capacity_bytes
    except Exception:
        vmem_cap = 64 * 1024 * 1024
    vmem_limit = int(min(vmem_cap * 3 // 4, 96 * 1024 * 1024))
    itemsize = jnp.dtype(h_src.dtype).itemsize
    blk_bytes = S * H * itemsize
    tb_cap = max(1, (vmem_limit // 3) // blk_bytes)   # 2x h_src bufs + headroom
    # TODO(synk): for very long sequences (2*S*H*itemsize > scoped VMEM), add an
    # S-tile grid axis with an online-softmax accumulator instead of TB=1.
    TB = _pick_batch_tile(B, tb, tb_cap)

    h_src_p, query_p, bias_p = h_src, query, bias
    Bp = pl.cdiv(B, TB) * TB
    if Bp != B:   # rare fallback; only hit when no multiple-of-8 tile divides B
        pad = Bp - B
        h_src_p = jnp.pad(h_src_p, ((0, pad), (0, 0), (0, 0)))
        query_p = jnp.pad(query_p, ((0, pad), (0, 0)))
        bias_p = jnp.pad(bias_p, ((0, pad), (0, 0)))

    cost = pl.CostEstimate(
        flops=4 * Bp * S * H,
        transcendentals=Bp * S,
        bytes_accessed=Bp * S * H * itemsize + Bp * (S + H) * 4 + Bp * H * itemsize)

    grid_spec = pltpu.PrefetchScalarGridSpec(
        num_scalar_prefetch=0,
        grid=(Bp // TB,),
        in_specs=[
            pl.BlockSpec((TB, S, H), lambda i: (i, 0, 0)),   # h_src batch tile
            pl.BlockSpec((TB, H), lambda i: (i, 0)),         # pre-projected query
            pl.BlockSpec((TB, S), lambda i: (i, 0)),         # additive mask bias
        ],
        out_specs=pl.BlockSpec((TB, H), lambda i: (i, 0)),
    )

    out = pl.pallas_call(
        _attention_kernel,
        out_shape=jax.ShapeDtypeStruct((Bp, H), out_dtype),
        grid_spec=grid_spec,
        compiler_params=pltpu.CompilerParams(
            dimension_semantics=("parallel",),
            vmem_limit_bytes=vmem_limit),
        cost_estimate=cost,
    )(h_src_p, query_p, bias_p)
    return out[:B].reshape(B, 1, H)


def attention_reference(h_src, h_t_tgt, weight_linear, mask=None):
    hp = lax.Precision.HIGHEST
    query = jnp.einsum("bh,oh->bo", h_t_tgt[:, 0, :], weight_linear,
                       precision=hp)                                  # (B,H)
    scores = jnp.einsum("bsh,bh->bs", h_src, query, precision=hp)     # (B,S)
    if mask is not None:
        scores = jnp.where(mask, -jnp.inf, scores)
    w = jax.nn.softmax(scores, axis=-1)
    ctx = jnp.einsum("bs,bsh->bh", w, h_src, precision=hp)            # (B,H)
    return ctx[:, None, :]


if __name__ == "__main__":
    B, S, H = 2, 8, 128   # hidden_size = 128 keeps the lane dim aligned

    key = jax.random.PRNGKey(0)
    k1, k2, k3 = jax.random.split(key, 3)
    h_src = jax.random.normal(k1, (B, S, H), dtype=jnp.float32)
    h_t_tgt = jax.random.normal(k2, (B, 1, H), dtype=jnp.float32)
    # Deterministic Linear(hidden, hidden, bias=False) weight, shape (H, H)
    w_linear = (jax.random.normal(k3, (H, H), dtype=jnp.float32)
                / jnp.sqrt(jnp.float32(H)))
    # Mask: mask out the tail of the second sequence (True = masked)
    lengths = jnp.array([S, S - 3])
    mask = jnp.arange(S)[None, :] >= lengths[:, None]                 # (B,S) bool

    # With mask
    out = attention_forward(h_src, h_t_tgt, w_linear, mask)
    out = jax.block_until_ready(out)
    ref = attention_reference(h_src, h_t_tgt, w_linear, mask)
    assert out.shape == (B, 1, H)
    assert jnp.allclose(out, ref, atol=1e-3, rtol=1e-3), "mismatch vs reference (mask)"

    # Without mask
    out2 = attention_forward(h_src, h_t_tgt, w_linear, None)
    out2 = jax.block_until_ready(out2)
    ref2 = attention_reference(h_src, h_t_tgt, w_linear, None)
    assert jnp.allclose(out2, ref2, atol=1e-3, rtol=1e-3), "mismatch vs reference (no mask)"

    print("KERNEL_OK")
</pallas_src>

<mosaic_0001>
module attributes {stable_mosaic.version = 11 : i64} {
  func.func @_attention_kernel(%arg0: i32, %arg1: memref<2x8x128xf32, #tpu.memory_space<vmem>>, %arg2: memref<2x128xf32, #tpu.memory_space<vmem>>, %arg3: memref<2x8xf32, #tpu.memory_space<vmem>>, %arg4: memref<2x128xf32, #tpu.memory_space<vmem>>) attributes {dimension_semantics = [#tpu.dimension_semantics<parallel>], iteration_bounds = array<i64: 1>, scalar_prefetch = 0 : i64, scratch_operands = 0 : i64, tpu.core_type = #tpu.core_type<tc>, window_params = [{transform_indices = @transform_0, window_bounds = array<i64: 2, 8, 128>}, {transform_indices = @transform_1, window_bounds = array<i64: 2, 128>}, {transform_indices = @transform_2, window_bounds = array<i64: 2, 8>}, {transform_indices = @transform_3, window_bounds = array<i64: 2, 128>}]} {
    %c0 = arith.constant 0 : index
    %c0_0 = arith.constant 0 : index
    %c0_1 = arith.constant 0 : index
    %0 = vector.load %arg1[%c0, %c0_0, %c0_1] : memref<2x8x128xf32, #tpu.memory_space<vmem>>, vector<2x8x128xf32>
    %c0_2 = arith.constant 0 : index
    %c0_3 = arith.constant 0 : index
    %1 = vector.load %arg2[%c0_2, %c0_3] : memref<2x128xf32, #tpu.memory_space<vmem>>, vector<2x128xf32>
    %c0_4 = arith.constant 0 : index
    %c0_5 = arith.constant 0 : index
    %2 = vector.load %arg3[%c0_4, %c0_5] : memref<2x8xf32, #tpu.memory_space<vmem>>, vector<2x8xf32>
    %3 = vector.shape_cast %1 : vector<2x128xf32> to vector<2x1x128xf32>
    %4 = vector.broadcast %3 : vector<2x1x128xf32> to vector<2x8x128xf32>
    %5 = arith.mulf %0, %4 : vector<2x8x128xf32>
    %cst = arith.constant dense<0.000000e+00> : vector<2x8xf32>
    %6 = vector.multi_reduction <add>, %5, %cst [2] : vector<2x8x128xf32> to vector<2x8xf32>
    %7 = arith.addf %6, %2 : vector<2x8xf32>
    %cst_6 = arith.constant dense<0xFF800000> : vector<2xf32>
    %8 = vector.multi_reduction <maximumf>, %7, %cst_6 [1] : vector<2x8xf32> to vector<2xf32>
    %9 = vector.shape_cast %8 : vector<2xf32> to vector<2x1xf32>
    %10 = vector.broadcast %9 : vector<2x1xf32> to vector<2x8xf32>
    %11 = arith.subf %7, %10 : vector<2x8xf32>
    %12 = math.exp %11 : vector<2x8xf32>
    %cst_7 = arith.constant dense<0.000000e+00> : vector<2xf32>
    %13 = vector.multi_reduction <add>, %12, %cst_7 [1] : vector<2x8xf32> to vector<2xf32>
    %14 = vector.shape_cast %13 : vector<2xf32> to vector<2x1xf32>
    %15 = vector.broadcast %14 : vector<2x1xf32> to vector<2x8xf32>
    %16 = arith.divf %12, %15 : vector<2x8xf32>
    %17 = vector.shape_cast %16 : vector<2x8xf32> to vector<2x8x1xf32>
    %18 = vector.broadcast %17 : vector<2x8x1xf32> to vector<2x8x128xf32>
    %19 = arith.mulf %18, %0 : vector<2x8x128xf32>
    %cst_8 = arith.constant dense<0.000000e+00> : vector<2x128xf32>
    %20 = vector.multi_reduction <add>, %19, %cst_8 [1] : vector<2x8x128xf32> to vector<2x128xf32>
    %c0_9 = arith.constant 0 : index
    %c0_10 = arith.constant 0 : index
    %21 = vector.load %arg4[%c0_9, %c0_10] : memref<2x128xf32, #tpu.memory_space<vmem>>, vector<2x128xf32>
    tpu.vector_store %arg4[%c0_9, %c0_10], %20 {strides = array<i32>} : memref<2x128xf32, #tpu.memory_space<vmem>>, vector<2x128xf32>,
    return
  }
  func.func @transform_0(%arg0: i32) -> (i32, i32, i32) {
    %c0_i32 = arith.constant 0 : i32
    %c0_i32_0 = arith.constant 0 : i32
    %c0_i32_1 = arith.constant 0 : i32
    return %arg0, %c0_i32, %c0_i32_0 : i32, i32, i32
  }
  func.func @transform_1(%arg0: i32) -> (i32, i32) {
    %c0_i32 = arith.constant 0 : i32
    %c0_i32_0 = arith.constant 0 : i32
    return %arg0, %c0_i32 : i32, i32
  }
  func.func @transform_2(%arg0: i32) -> (i32, i32) {
    %c0_i32 = arith.constant 0 : i32
    %c0_i32_0 = arith.constant 0 : i32
    return %arg0, %c0_i32 : i32, i32
  }
  func.func @transform_3(%arg0: i32) -> (i32, i32) {
    %c0_i32 = arith.constant 0 : i32
    %c0_i32_0 = arith.constant 0 : i32
    return %arg0, %c0_i32 : i32, i32
  }
}

</mosaic_0001>

<bundles_post_ra>
// kernel: tpu_custom_call.1
= control target key start
LH: loop header
LB: loop body
LE: loop exit
PB: predicated region body
PF: predicated region fallthrough
CT: control target
= control target key end

     0   :  { %8 = vsyncpa [#allocation3], 0  ;;  %s393_s0 = inlined_call_operand.hbm [shape: f32[2,8,128], index: 0, kind: input, shape index: {}]   ;;  %s394_s1 = inlined_call_operand.hbm [shape: f32[2,128], index: 1, kind: input, shape index: {}]   ;;  %s395_s2 = inlined_call_operand.hbm [shape: f32[2,8], index: 2, kind: input, shape index: {}]   ;;  %s396_s3 = inlined_call_operand.hbm [shape: f32[2,128], index: 3, kind: output, shape index: {}]  }
   0x1   :  { %9 = vsyncpa [#allocation6], 0  ;;  %s29_s14 = sshll.u32 %s394_s1, 4  ;;  %s30_s14 = int_to_ptr.hbm [resolvable:$true] %s29_s14 }
   0x2   :  { %10 = vsyncpa [#allocation4], 0  ;;  %s341_s15 = smov [#allocation5]   ;;  %s15_s19 = sshll.u32 %s393_s0, 4  ;;  %s16_s19 = int_to_ptr.hbm [resolvable:$true] %s15_s19 }
   0x3   :  { %s31_s16 = sshll.u32 %s341_s15, 4  ;;  %s342_s20 = smov [#allocation2]   ;;  %s32_s16 = int_to_ptr.vmem [resolvable:$true] %s31_s16 }
   0x4   :  { %34 = dma.hbm_to_vmem [thread:$0]  %s30_s14, 32, %s32_s16, [#allocation6]  }
   0x5   :  { %s17_s21 = sshll.u32 %s342_s20, 4  ;;  %s343_s22 = smov 128   ;;  %s18_s21 = int_to_ptr.vmem [resolvable:$true] %s17_s21 }
   0x6   :  { %s344_s23 = smov 8   ;;  %s40_s1 = sshll.u32 %s395_s2, 4  ;;  %s41_s1 = int_to_ptr.hbm [resolvable:$true] %s40_s1 }
   0x7   :  { %23 = dma.hbm_to_vmem [thread:$0]  %s16_s19, 256, %s18_s21, [#allocation3], %s343_s22, %s343_s22, %s344_s23  }
   0x8   :  { %s345_s26 = smov [#allocation7]  }
   0x9   :  { %s42_s27 = sshll.u32 %s345_s26, 4  ;;  %s43_s27 = int_to_ptr.vmem [resolvable:$true] %s42_s27 }
   0xa   :  { %45 = dma.hbm_to_vmem [thread:$0]  %s41_s1, 32, %s43_s27, [#allocation6]  }
   0xb   :  { %335 = dma.done.wait [#allocation3], 256  }
   0xc   :  { %336 = vsyncadd [#allocation3], 4294967040 }
   0xd   :  { %337 = dma.done.wait [#allocation6], 64  }
   0xe   :  { %338 = vsyncadd [#allocation6], 4294967232  ;;  %v76_v0 = vlaneseq  ;;  %v61_v2 = vld [vmem:[#allocation7] sm:$0x3]  ;;  %v377_v3 = vld [vmem:[#allocation2] sm:$0xff]  ;;  %v346_v13 = vmov 0  }
   0xf   :  { %v60_v4 = vld [vmem:[#allocation5] sm:$0x3]  ;;  %v75_v5 = vperm.slane %v61_v2, 0  ;;  %v380_v10 = vld [vmem:[#allocation2 + $0x8] sm:$0xff]  ;;  %v82_v11 = vperm.slane %v61_v2, 1  ;;  %228 = vset.pattern.permute.xlu2 %v346_v13  ;;  %230 = vset.pattern.permute.xlu0 %v346_v13  ;;  %vm105_vm0 = vcmask 1041409  }
  0x10   :  { %v77_v1 = vshrl.u32 %v76_v0, 7  ;;  %v64_v6 = vperm.slane %v60_v4, 0  ;;  %v63_v7 = vrot.slane %v60_v4, 1  ;;  %v102_v21 = vand.u32 127, %v76_v0  ;;  %s347_s0 = smov [#allocation8]   ;;  %s209_s30 = sshll.u32 %s396_s3, 4  ;;  %s210_s30 = int_to_ptr.hbm [resolvable:$true] %s209_s30 }
  0x11   :  { %vm108_vm1 = vcmask 58368   ;;  %s207_s2 = sshll.u32 %s347_s0, 4  ;;  %s208_s2 = int_to_ptr.vmem [resolvable:$true] %s207_s2 }
  0x12   :  { %227 = vset.pattern.permute.xlu1 %v77_v1  ;;  %v68_v8 = vmul.f32 %v64_v6, %v377_v3  ;;  %v65_v9 = vperm.slane %v63_v7, 0 }
  0x14   :  { %70 = vadd.xlane.f32.xlu0 %v68_v8  ;;  %v69_v12 = vmul.f32 %v65_v9, %v380_v10 }
  0x1a   :  { %80 = vperm.xlu1 %227, %v75_v5  }
  0x1c   :  { %72 = vadd.xlane.f32.xlu0 %v69_v12 }
  0x22   :  { %87 = vperm.xlu1 %227, %v82_v11  }
  0x2a   :  { %229 = vset.pattern.permute.xlu1 %v346_v13 }
  0x87   :  { %v71_v15 = vpop.xlane.xlu0 %70 }
  0x8c   :  { %v81_v14 = vpop.permute.xlu1 %80 }
  0x8d   :  { %v91_v16 = vadd.f32 %v81_v14, %v71_v15 }
  0x8f   :  { %96 = vperm.xlu2 %228, %v91_v16   ;;  %v73_v18 = vpop.xlane.xlu0 %72 }
  0x94   :  { %v88_v17 = vpop.permute.xlu1 %87 }
  0x95   :  { %v92_v19 = vadd.f32 %v88_v17, %v73_v18 }
  0x97   :  { %99 = vperm.xlu2 %228, %v92_v19  }
  0xe9   :  { %v97_v20 = vpop.permute.xlu2 %96 }
  0xea   :  { %v103_v23 = vperm.slane %v97_v20, %v102_v21 }
  0xf1   :  { %v100_v22 = vpop.permute.xlu2 %99 }
  0xf2   :  { %v104_v24 = vperm.slane %v100_v22, %v102_v21 }
  0xf4   :  { %v106_v25 = vsel %vm105_vm0, %v104_v24, %v103_v23 }
  0xf5   :  { %v109_v26 = vsel %vm108_vm1, %v106_v25, -inf }
  0xf6   :  { %110 = vmax.xlane.f32.xlu0 %v109_v26 }
 0x169   :  { %v111_v27 = vpop.xlane.xlu0 %110 }
 0x16a   :  { %v113_v28 = vperm.slane %v111_v27, 0  ;;  %v114_v29 = vperm.slane %v111_v27, 1 }
 0x16c   :  { %v117_v30 = vsub.f32 %v91_v16, %v113_v28  ;;  %v118_v31 = vsub.f32 %v92_v19, %v114_v29 }
 0x16e   :  { %v119_v32 = vmul.f32 1.442695, %v117_v30  ;;  %v121_v33 = vmul.f32 1.442695, %v118_v31 }
 0x170   :  { %231 = vpow2.f32 %v119_v32 }
 0x171   :  { %233 = vpow2.f32 %v121_v33 }
 0x176   :  { %v232_v34 = vpop.eup %231 }
 0x177   :  { %v234_v35 = vpop.eup %233  ;;  %126 = vperm.xlu1 %229, %v232_v34  }
 0x178   :  { %129 = vperm.xlu2 %228, %v234_v35  }
 0x1d2   :  { %v130_v36 = vpop.permute.xlu2 %129 }
 0x1d3   :  { %v132_v38 = vperm.slane %v130_v36, %v102_v21 }
 0x1e9   :  { %v127_v37 = vpop.permute.xlu1 %126 }
 0x1ea   :  { %v131_v39 = vperm.slane %v127_v37, %v102_v21 }
 0x1ec   :  { %v133_v40 = vsel %vm105_vm0, %v132_v38, %v131_v39 }
 0x1ed   :  { %v135_v41 = vsel %vm108_vm1, %v133_v40, 0.0 }
 0x1ee   :  { %136 = vadd.xlane.f32.xlu0 %v135_v41 }
 0x261   :  { %v137_v42 = vpop.xlane.xlu0 %136 }
 0x262   :  { %v139_v43 = vperm.slane %v137_v42, 0  ;;  %v140_v44 = vperm.slane %v137_v42, 1 }
 0x264   :  { %235 = vrcp.f32 %v139_v43  ;;  %v154_v51 = vand.u32 2147483648, %v139_v43  ;;  %v169_v52 = vand.u32 2147483648, %v140_v44  ;;  %v152_v54 = vand.u32 2147483647, %v139_v43 }
 0x265   :  { %237 = vrcp.f32 %v140_v44  ;;  %v167_v56 = vand.u32 2147483647, %v140_v44  ;;  %vm148_vm4 = vweird.f32 %v139_v43  ;;  %vm163_vm5 = vweird.f32 %v140_v44 }
 0x266   :  { %v155_v59 = vor.u32 1.1754944e-38, %v154_v51  ;;  %v170_v60 = vor.u32 1.1754944e-38, %v169_v52  ;;  %vm153_vm8 = vcmp.eq.f32.partialorder %v152_v54, 8.507059e+37 }
 0x267   :  { %vm168_vm9 = vcmp.eq.f32.partialorder %v167_v56, 8.507059e+37 }
 0x26a   :  { %v236_v45 = vpop.eup %235 }
 0x26b   :  { %v238_v46 = vpop.eup %237  ;;  %v144_v47 = vmul.f32 %v236_v45, %v139_v43  ;;  %vm149_vm2 = vweird.f32 %v236_v45 }
 0x26c   :  { %v159_v48 = vmul.f32 %v238_v46, %v140_v44  ;;  %vm164_vm3 = vweird.f32 %v238_v46  ;;  %vm150_vm6 = vmor %vm148_vm4, %vm149_vm2 }
 0x26d   :  { %v145_v49 = vsub.f32 1.0, %v144_v47  ;;  %vm165_vm7 = vmor %vm163_vm5, %vm164_vm3 }
 0x26e   :  { %v160_v50 = vsub.f32 1.0, %v159_v48 }
 0x26f   :  { %v146_v53 = vmul.f32 %v236_v45, %v145_v49 }
 0x270   :  { %v161_v55 = vmul.f32 %v238_v46, %v160_v50 }
 0x271   :  { %v147_v57 = vadd.f32 %v236_v45, %v146_v53 }
 0x272   :  { %v162_v58 = vadd.f32 %v238_v46, %v161_v55 }
 0x273   :  { %v151_v61 = vsel %vm150_vm6, %v236_v45, %v147_v57 }
 0x274   :  { %v166_v62 = vsel %vm165_vm7, %v238_v46, %v162_v58  ;;  %v156_v63 = vsel %vm153_vm8, %v155_v59, %v151_v61 }
 0x275   :  { %v171_v0 = vsel %vm168_vm9, %v170_v60, %v166_v62  ;;  %v157_v1 = vmul.f32 %v232_v34, %v156_v63 }
 0x276   :  { %v172_v2 = vmul.f32 %v234_v35, %v171_v0 }
 0x277   :  { %175 = vperm.xlu1 %229, %v157_v1  }
 0x278   :  { %180 = vperm.xlu2 %228, %v172_v2  }
 0x2d2   :  { %v181_v4 = vpop.permute.xlu2 %180 }
 0x2d3   :  { %v184_v5 = vmul.f32 %v181_v4, %v380_v10 }
 0x2d5   :  { %v191_v6 = vrot.slane %v184_v5, 4 }
 0x2d7   :  { %v192_v7 = vadd.f32 %v191_v6, %v184_v5 }
 0x2d9   :  { %v193_v9 = vrot.slane %v192_v7, 2 }
 0x2db   :  { %v194_v13 = vadd.f32 %v193_v9, %v192_v7 }
 0x2dd   :  { %v195_v16 = vrot.slane %v194_v13, 1 }
 0x2df   :  { %v196_v10 = vadd.f32 %v195_v16, %v194_v13 }
 0x2e9   :  { %v176_v8 = vpop.permute.xlu1 %175 }
 0x2ea   :  { %v183_v11 = vmul.f32 %v176_v8, %v377_v3 }
 0x2ec   :  { %v185_v12 = vrot.slane %v183_v11, 4 }
 0x2ee   :  { %v186_v14 = vadd.f32 %v185_v12, %v183_v11 }
 0x2f0   :  { %v187_v15 = vrot.slane %v186_v14, 2 }
 0x2f2   :  { %v188_v17 = vadd.f32 %v187_v15, %v186_v14 }
 0x2f4   :  { %v189_v18 = vrot.slane %v188_v17, 1 }
 0x2f6   :  { %v190_v19 = vadd.f32 %v189_v18, %v188_v17 }
 0x2f8   :  { %v199_v20 = vsel %vm105_vm0, %v196_v10, %v190_v19 }
 0x2f9   :  { %201 = vst [vmem:[#allocation8] sm:$0x3] %v199_v20 }
 0x2fa   :  { %212 = dma.vmem_to_hbm [thread:$0]  %s208_s2, 32, %s210_s30, [#allocation4]  }
 0x2fb   :  { %339 = dma.done.wait [#allocation4], 32  }
 0x2fc   :  { %340 = vsyncadd [#allocation4], 4294967264 }
 0x2fd   :  { %217 = vsyncpa [#allocation3], 1 }
 0x2fe   :  { %218 = vsyncpa [#allocation6], 1 }
 0x2ff   :  { %219 = vsyncpa [#allocation4], 1 }

</bundles_post_ra>
